<compile_context>
chip_gen: v7x
topology: tpu7x:2x2x1
jax: 0.10.0
libtpu: 0.0.40
codegen_flags: <defaults>
</compile_context>

<pallas_src>
import math

import jax
import jax.numpy as jnp
from jax.experimental import pallas as pl
from jax.experimental.pallas import tpu as pltpu


def _round_up(x, m):
    return (x + m - 1) // m * m


# -----------------------------------------------------------------------------
# Stage 1: h = x @ W   ([n_pad, in_p] @ [in_p, out_p] -> bf16 [n_pad, out_p])
# -----------------------------------------------------------------------------
def _xw_kernel(x_ref, w_ref, h_ref):
    h_ref[...] = jnp.dot(
        x_ref[...], w_ref[...], preferred_element_type=jnp.float32
    ).astype(h_ref.dtype)


# -----------------------------------------------------------------------------
# Stage 2: out = PReLU(adj @ h + bias), tiled over (row tiles, K tiles)
# -----------------------------------------------------------------------------
def _agg_kernel(adj_ref, h_ref, b_ref, alpha_ref, o_ref, acc_ref):
    k = pl.program_id(1)
    tk = adj_ref.shape[1]

    @pl.when(k == 0)
    def _init():
        acc_ref[...] = jnp.zeros_like(acc_ref)

    # K-slice of the VMEM-resident h (constant block index -> DMA'd once).
    start = pl.multiple_of(k * tk, 128)
    h_blk = h_ref[pl.ds(start, tk), :]
    acc_ref[...] += jnp.dot(adj_ref[...], h_blk,
                            preferred_element_type=jnp.float32)

    @pl.when(k == pl.num_programs(1) - 1)
    def _finalize():
        out = acc_ref[...] + b_ref[...]
        alpha = alpha_ref[0]                       # scalar read from SMEM
        o_ref[...] = jnp.where(out >= 0.0, out, alpha * out).astype(o_ref.dtype)


def gcn_conv(x, adj, weight_t, bias, alpha, *, tm=512, tk=1024,
             vmem_limit_bytes=64 * 1024 * 1024):
    """x: [N, in_ft] f32, adj: [N, N] f32, weight_t: [in_ft, out_ft] f32,
    bias: [1, out_ft] f32, alpha: [1] f32  ->  [N, out_ft] f32."""
    assert tm % 128 == 0 and tk % 128 == 0
    n, in_ft = x.shape
    out_ft = weight_t.shape[1]

    # Lane-dense feature dims; node dim padded to the tile LCM.
    in_p = _round_up(in_ft, 128)
    out_p = _round_up(out_ft, 128)
    n128 = _round_up(n, 128)
    tm = min(tm, n128)
    tk = min(tk, n128)
    if math.lcm(tm, tk) > n128:     # avoid pathological padding for odd sizes
        tm = tk = min(tm, tk)
    n_pad = _round_up(n, math.lcm(tm, tk))

    x_p = jnp.pad(x, ((0, n_pad - n), (0, in_p - in_ft)))
    w_p = jnp.pad(weight_t, ((0, in_p - in_ft), (0, out_p - out_ft)))
    b_p = jnp.pad(bias, ((0, 0), (0, out_p - out_ft)))
    adj_p = jnp.pad(adj, ((0, n_pad - n), (0, n_pad - n))).astype(jnp.bfloat16)

    # ---- Stage 1: h = x @ W (bf16 result, lane-dense) ------------------------
    h = pl.pallas_call(
        _xw_kernel,
        out_shape=jax.ShapeDtypeStruct((n_pad, out_p), jnp.bfloat16),
        grid_spec=pltpu.PrefetchScalarGridSpec(
            num_scalar_prefetch=0,
            grid=(n_pad // tm,),
            in_specs=[
                pl.BlockSpec((tm, in_p), lambda i: (i, 0)),
                pl.BlockSpec((in_p, out_p), lambda i: (0, 0)),
            ],
            out_specs=pl.BlockSpec((tm, out_p), lambda i: (i, 0)),
        ),
        compiler_params=pltpu.CompilerParams(
            dimension_semantics=("parallel",),
            vmem_limit_bytes=vmem_limit_bytes,
        ),
    )(x_p, w_p)

    # ---- Stage 2: out = PReLU(adj @ h + bias) --------------------------------
    out = pl.pallas_call(
        _agg_kernel,
        out_shape=jax.ShapeDtypeStruct((n_pad, out_p), jnp.float32),
        grid_spec=pltpu.PrefetchScalarGridSpec(
            num_scalar_prefetch=0,
            grid=(n_pad // tm, n_pad // tk),
            in_specs=[
                pl.BlockSpec((tm, tk), lambda i, k: (i, k)),        # adj tile
                pl.BlockSpec((n_pad, out_p), lambda i, k: (0, 0)),  # resident h
                pl.BlockSpec((1, out_p), lambda i, k: (0, 0)),      # bias
                pl.BlockSpec(memory_space=pltpu.MemorySpace.SMEM),  # alpha
            ],
            out_specs=pl.BlockSpec((tm, out_p), lambda i, k: (i, 0)),
            scratch_shapes=[pltpu.VMEM((tm, out_p), jnp.float32)],
        ),
        compiler_params=pltpu.CompilerParams(
            dimension_semantics=("parallel", "arbitrary"),
            vmem_limit_bytes=vmem_limit_bytes,
        ),
    )(adj_p, h, b_p, alpha)

    return out[:n, :out_ft]


def init_params(key, in_ft, out_ft, act="PReLU"):
    """Deterministic parameter init matching GCNConv.__init__ semantics."""
    k_w, k_b = jax.random.split(key)
    # xavier_uniform_ on a [out_ft, in_ft] Linear weight
    limit = (6.0 / (in_ft + out_ft)) ** 0.5
    w = jax.random.uniform(k_w, (out_ft, in_ft), jnp.float32, -limit, limit)
    # NOTE: the PyTorch module's standalone `bias` Parameter is never
    # explicitly initialized (uninitialized FloatTensor); we init it
    # deterministically with small random values instead.
    bias = 0.01 * jax.random.normal(k_b, (1, out_ft), jnp.float32)
    # PReLU default init is 0.25; ReLU == PReLU with alpha = 0
    alpha = jnp.full((1,), 0.25 if act == "PReLU" else 0.0, jnp.float32)
    return w.T, bias, alpha  # weight returned pre-transposed: [in_ft, out_ft]


if __name__ == "__main__":
    key = jax.random.PRNGKey(0)
    k_x, k_adj, k_p = jax.random.split(key, 3)

    N, IN_FT, OUT_FT = 200, 48, 32  # small synthetic graph

    x = jax.random.normal(k_x, (N, IN_FT), jnp.float32)
    # Symmetric row-normalized dense adjacency (spmm treated densely)
    a = (jax.random.uniform(k_adj, (N, N)) < 0.15).astype(jnp.float32)
    a = jnp.minimum(a + a.T + jnp.eye(N, dtype=jnp.float32), 1.0)
    adj = a / jnp.sum(a, axis=1, keepdims=True)

    weight_t, bias, alpha = init_params(k_p, IN_FT, OUT_FT, act="PReLU")

    # Small tiles so the demo exercises a real (row x K) grid: 256/128 -> 2x2.
    out = gcn_conv(x, adj, weight_t, bias, alpha, tm=128, tk=128)
    jax.block_until_ready(out)

    # Reference in plain JAX (f32). Kernel uses bf16 adj/h -> loose tolerance.
    ref = adj @ (x @ weight_t) + bias
    ref = jnp.where(ref >= 0.0, ref, alpha[0] * ref)
    assert out.shape == (N, OUT_FT)
    assert jnp.allclose(out, ref, atol=2e-2, rtol=2e-2), float(
        jnp.max(jnp.abs(out - ref)))

    print("KERNEL_OK")
</pallas_src>

<mosaic_0001>
module attributes {stable_mosaic.version = 11 : i64} {
  func.func @_xw_kernel(%arg0: i32, %arg1: memref<128x128xf32, #tpu.memory_space<vmem>>, %arg2: memref<128x128xf32, #tpu.memory_space<vmem>>, %arg3: memref<128x128xbf16, #tpu.memory_space<vmem>>) attributes {dimension_semantics = [#tpu.dimension_semantics<parallel>], iteration_bounds = array<i64: 2>, scalar_prefetch = 0 : i64, scratch_operands = 0 : i64, tpu.core_type = #tpu.core_type<tc>, window_params = [{transform_indices = @transform_0, window_bounds = array<i64: 128, 128>}, {pipeline_mode = #tpu.pipeline_mode<synchronous>, transform_indices = @transform_1, window_bounds = array<i64: 128, 128>}, {transform_indices = @transform_2, window_bounds = array<i64: 128, 128>}]} {
    %c0 = arith.constant 0 : index
    %c0_0 = arith.constant 0 : index
    %0 = vector.load %arg1[%c0, %c0_0] : memref<128x128xf32, #tpu.memory_space<vmem>>, vector<128x128xf32>
    %c0_1 = arith.constant 0 : index
    %c0_2 = arith.constant 0 : index
    %1 = vector.load %arg2[%c0_1, %c0_2] : memref<128x128xf32, #tpu.memory_space<vmem>>, vector<128x128xf32>
    %cst = arith.constant dense<0.000000e+00> : vector<128x128xf32>
    %2 = tpu.matmul %0, %1, %cst {dimension_numbers = #tpu.dot_dimension_numbers<[1], [0], [0], [1], [0, 0, 1, 1], [], []>} : vector<128x128xf32>, vector<128x128xf32>, vector<128x128xf32> -> vector<128x128xf32>
    %3 = arith.truncf %2 : vector<128x128xf32> to vector<128x128xbf16>
    %c0_3 = arith.constant 0 : index
    %c0_4 = arith.constant 0 : index
    %4 = vector.load %arg3[%c0_3, %c0_4] : memref<128x128xbf16, #tpu.memory_space<vmem>>, vector<128x128xbf16>
    tpu.vector_store %arg3[%c0_3, %c0_4], %3 {strides = array<i32>} : memref<128x128xbf16, #tpu.memory_space<vmem>>, vector<128x128xbf16>,
    return
  }
  func.func @transform_0(%arg0: i32) -> (i32, i32) {
    %c0_i32 = arith.constant 0 : i32
    %c0_i32_0 = arith.constant 0 : i32
    return %arg0, %c0_i32 : i32, i32
  }
  func.func @transform_1(%arg0: i32) -> (i32, i32) {
    %c0_i32 = arith.constant 0 : i32
    %c0_i32_0 = arith.constant 0 : i32
    %c0_i32_1 = arith.constant 0 : i32
    return %c0_i32, %c0_i32_0 : i32, i32
  }
  func.func @transform_2(%arg0: i32) -> (i32, i32) {
    %c0_i32 = arith.constant 0 : i32
    %c0_i32_0 = arith.constant 0 : i32
    return %arg0, %c0_i32 : i32, i32
  }
}

</mosaic_0001>

<bundles_post_ra>
// kernel: tpu_custom_call.1
= control target key start
LH: loop header
LB: loop body
LE: loop exit
PB: predicated region body
PF: predicated region fallthrough
CT: control target
= control target key end

     0   :  { %7 = vsyncpa [#allocation3], 0  ;;  %s1205_s0 = inlined_call_operand.hbm [shape: f32[256,128], index: 0, kind: input, shape index: {}]   ;;  %s1206_s1 = inlined_call_operand.hbm [shape: f32[128,128], index: 1, kind: input, shape index: {}]   ;;  %s1207_s2 = inlined_call_operand.hbm [shape: bf16[256,128], index: 2, kind: output, shape index: {}]  }
   0x1   :  { %9 = vsyncpa [#allocation3 + $0x1], 0 }
   0x2   :  { %10 = vsyncpa [#allocation6], 0 }
   0x3   :  { %11 = vsyncpa [#allocation4], 0 }
   0x4   :  { %13 = vsyncpa [#allocation4 + $0x1], 0  ;;  %s979_s9 = smov 0   ;;  %s981_s10 = smov 0  }
   0x5   :  { %s983_s11 = smov 0   ;;  %s985_s12 = smov 0  }
   0x6 LB: > { %s1000_s13 = sadd.s32 4294967295, %s955_s12   ;;  %s533_s14 = sadd.s32 4294967294, %s955_s12   ;;  %s955_s12 = sphi %s985_s12, %s1227_s12   ;;  %s951_s11 = sphi %s983_s11, %s1226_s11   ;;  %s947_s10 = sphi %s981_s10, %s1225_s10   ;;  %s943_s9 = sphi %s979_s9, %s1224_s9  }
   0x7   : > { %p39_p0 = scmp.ne.s32.totalorder %s947_s10, %s943_s9  ;;  %p1208_p1 = scmp.eq.s32.totalorder %s1000_s13, 0 }
   0x8   : > { %p90_p3 = scmp.eq.s32.totalorder %s533_s14, 1  ;;  %p534_p5 = scmp.ge.s32.totalorder %s955_s12, 1 }
   0x9   : > { %p1009_p4 = por %p1208_p1, %p39_p0  ;;  %p97_p7 = scmp.lt.s32.totalorder %s955_s12, 3 }
   0xa   : > { %p1014_p6 = por %p90_p3, %p39_p0  ;;  %s957_s18 = smov [#allocation5]  }
   0xb   : > { %s1211_s15 = scalar_select %p1009_p4, 1, 0 }
   0xc   : > { %s1212_s16 = scalar_select %p1014_p6, 1, 0 }
   0xd   : > { %p1019_p8 = pnand %p534_p5, %p97_p7  ;;  %s109_s19 = sshll.u32 %s957_s18, 4  ;;  %s1023_s19 = int_to_ptr.vmem [resolvable:$true] %s109_s19 }
   0xe   : > { %s1035_s21 = sadd.s32 1, %s955_s12   ;;  %s26_s22 = sadd.s32 1, %s951_s11 }
   0xf   : > { %s1213_s17 = scalar_select %p1019_p8, 1, 0 }
  0x10   : > { %p774_p9 = pneg %p1019_p8  ;;  %s23_s23 = ssub.s32 %s955_s12, %s1035_s21 }
  0x11   : > { %s827_s26 = scalar_lea.hbm %s1206_s1, 2048 }
  0x12   : > { %p1030_p11 = pnand %p774_p9, %p1208_p1  ;;  %p828_p12 = scmp.ne.s32.totalorder %s1206_s1, %s827_s26 }
  0x13   : > { %p834_p5 = scmp.lt.u32.totalorder %s827_s26, %s1206_s1 }
  0x14   : > { %p829_p13 = pneg %p1030_p11 }
  0x16   : > { %p830_p0 = pnand %p829_p13, %p828_p12 }
  0x18   : > { %p831_p3 = pneg %p830_p0 }
  0x1a   : > { %p836_p7 = pnand %p834_p5, %p831_p3 }
  0x1c   : > { %839 = shalt.err (!%p836_p7)
}
  0x1d   : > { %s840_s3 = scalar_lea.vmem %s1023_s19, 2048  ;;  %p848_p2 = scmp.lt.s32.totalorder %s1023_s19, %s1023_s19 }
  0x1e   : > { %p841_p9 = scmp.ne.s32.totalorder %s1023_s19, %s840_s3  ;;  %p849_p6 = scmp.lt.s32.totalorder %s840_s3, %s840_s3 }
  0x20   : > { %p843_p10 = pnand %p841_p9, %p829_p13  ;;  %p850_p4 = por %p849_p6, %p848_p2 }
  0x22   : > { %p844_p1 = pneg %p843_p10 }
  0x24   : > { %p851_p8 = pnand %p850_p4, %p844_p1 }
  0x26   : > { %854 = shalt.err (!%p851_p8)
}
  0x27   : > { %s958_s4 = smov 128   ;;  %s959_s5 = smov 8  }
  0x28   : > { %777 = dma.hbm_to_vmem [thread:$0]  (!%p1030_p11), %s1206_s1, 2048, %s1023_s19, [#allocation6], %s958_s4, %s958_s4, %s959_s5  }
  0x29   : > { %p24_p1 = scmp.eq.s32.totalorder %s23_s23, 0  ;;  %p33_p2 = scmp.ne.s32.totalorder %s951_s11, %s947_s10 }
  0x2a   : > { %p34_p4 = scmp.eq.s32.totalorder %s955_s12, 0  ;;  %p787_p6 = scmp.lt.s32.totalorder %s955_s12, 2 }
  0x2b   : > { %s1069_s8 = scalar_select %p24_p1, %s951_s11, %s26_s22  }
  0x2c   : > { %p35_p8 = por %p34_p4, %p33_p2  ;;  %p1215_p10 = scmp.eq.s32.totalorder %s1000_s13, 1 }
  0x2d   : > { %s123_s18 = sand.u32 1, %s951_s11   ;;  %s565_s20 = sshll.u32 %s955_s12, 11 }
  0x2e   : > { %p1073_p12 = por %p1215_p10, %p33_p2  ;;  %s537_s24 = sshll.u32 %s123_s18, 7 }
  0x2f   : > { %s1082_s27 = scalar_lea.hbm %s1205_s0, %s565_s20  ;;  %s127_s19 = scalar_lea.vmem [#allocation2], %s537_s24 }
  0x30   : > { %s134_s22 = sshll.u32 %s127_s19, 4  ;;  %p1084_p11 = pnand %p787_p6, %p35_p8  ;;  %s1088_s22 = int_to_ptr.vmem [resolvable:$true] %s134_s22 }
  0x31   : > { %s1090_s28 = scalar_lea.sflag [#allocation3], %s123_s18  ;;  %s855_s29 = scalar_lea.hbm %s1082_s27, 2048 }
  0x32   : > { %p856_p13 = scmp.ne.s32.totalorder %s1082_s27, %s855_s29  ;;  %p857_p0 = pneg %p1084_p11 }
  0x33   : > { %s860_s6 = scalar_lea.hbm %s1205_s0, 4096  ;;  %p861_p7 = scmp.lt.u32.totalorder %s1082_s27, %s1205_s0 }
  0x34   : > { %p858_p3 = pnand %p857_p0, %p856_p13  ;;  %p862_p9 = scmp.lt.u32.totalorder %s860_s6, %s855_s29 }
  0x35   : > { %p864_p2 = scmp.lt.u32.totalorder %s855_s29, %s1082_s27 }
  0x36   : > { %p859_p5 = pneg %p858_p3  ;;  %p863_p1 = por %p862_p9, %p861_p7 }
  0x38   : > { %p865_p4 = por %p864_p2, %p863_p1 }
  0x3a   : > { %p866_p6 = pnand %p865_p4, %p859_p5 }
  0x3c   : > { %869 = shalt.err (!%p866_p6)
}
  0x3d   : > { %s870_s18 = scalar_lea.vmem %s1088_s22, 2048  ;;  %s960_s24 = smov [#allocation2]  }
  0x3e   : > { %p871_p8 = scmp.ne.s32.totalorder %s1088_s22, %s870_s18  ;;  %s875_s25 = sshll.u32 %s960_s24, 4  ;;  %s876_s25 = int_to_ptr.vmem [resolvable:$false] %s875_s25 }
  0x3f   : > { %s877_s26 = scalar_lea.vmem %s876_s25, 4096  ;;  %p878_p3 = scmp.lt.s32.totalorder %s1088_s22, %s876_s25 }
  0x40   : > { %p873_p10 = pnand %p871_p8, %p857_p0  ;;  %p879_p7 = scmp.lt.s32.totalorder %s877_s26, %s870_s18 }
  0x42   : > { %p874_p13 = pneg %p873_p10  ;;  %p880_p9 = por %p879_p7, %p878_p3 }
  0x44   : > { %p881_p1 = pnand %p880_p9, %p874_p13 }
  0x46   : > { %884 = shalt.err (!%p881_p1)
}
  0x47   : > { %781 = dma.hbm_to_vmem [thread:$0]  (!%p1084_p11), %s1082_s27, 2048, %s1088_s22, %s1090_s28, %s958_s4, %s958_s4, %s959_s5  }
  0x48   : > { %p1218_p0 = scmp.ne.s32.totalorder %s1213_s17, 0 }
  0x49   : > { %s1124_s19 = sand.u32 (!%p1218_p0), 1, %s947_s10   ;;  %p1219_p5 = scmp.ne.s32.totalorder (!%p1218_p0), %s1211_s15, 0 }
  0x4a   : > { %146 = sbr.rel (%p1218_p0) target bundleno = 362 (0x16a), region = 28  ;;  %s541_s29 = sshll.u32 (!%p1218_p0), %s1124_s19, 7 }
  0x4b   : > { %s149_s30 = scalar_lea.sflag (!%p1218_p0), [#allocation3], %s1124_s19  ;;  %s1128_s3 = scalar_lea.vmem (!%p1218_p0), [#allocation2], %s541_s29 }
  0x51   : > { %930 = dma.done.wait (%p1219_p5), %s149_s30, 2048  }
  0x52   : > { %932 = vsyncadd (%p1219_p5), %s149_s30, 4294965248  ;;  %p1220_p11 = scmp.eq.s32.totalorder %s1000_s13, 0 }
  0x54   : > { %934 = dma.done.wait (%p1220_p11), [#allocation6], 2048   ;;  %p1221_p2 = pmov %p1220_p11 }
  0x55   : > { %v195_v0 = vld [vmem:[#allocation5] sm:$0xff]  ;;  %v196_v1 = vld [vmem:[#allocation5 + $0x8] sm:$0xff]  ;;  %v197_v2 = vld [vmem:[#allocation5 + $0x10] sm:$0xff]  ;;  %s543_s15 = sshll.u32 %s1124_s19, 6  ;;  %s582_s5 = sshll.u32 %s1000_s13, 10 }
  0x56   : > { %936 = vsyncadd (%p1221_p2), [#allocation6], 4294965248  ;;  %v718_v3 = vpack.c.bf16 %v196_v1, %v195_v0  ;;  %v198_v4 = vld [vmem:[#allocation5 + $0x18] sm:$0xff]  ;;  %v199_v6 = vld [vmem:[#allocation5 + $0x20] sm:$0xff]  ;;  %s176_s17 = scalar_lea.vmem [#allocation7], %s543_s15  ;;  %s1161_s23 = scalar_lea.hbm %s1207_s2, %s582_s5 }
  0x57   : > { %v722_v5 = vpack.c.bf16 %v198_v4, %v197_v2  ;;  %v200_v7 = vld [vmem:[#allocation5 + $0x28] sm:$0xff]  ;;  %v179_v9 = vld [vmem:[%s1128_s3] sm:$0xff]  ;;  %v201_v11 = vld [vmem:[#allocation5 + $0x30] sm:$0xff]  ;;  %s450_s4 = sshll.u32 %s176_s17, 4  ;;  %s437_s13 = scalar_lea.sflag [#allocation4], %s1124_s19  ;;  %s1156_s4 = int_to_ptr.vmem [resolvable:$true] %s450_s4 }
  0x58   : > { %719 = vmatprep.subr.bf16.mxu0 %v718_v3  ;;  %750 = vmatprep.subr.bf16.mxu1 %v718_v3  ;;  %v726_v8 = vpack.c.bf16 %v200_v7, %v199_v6  ;;  %v187_v10 = vld [vmem:[%s1128_s3 + $0x40] sm:$0xff]  ;;  %v202_v12 = vld [vmem:[#allocation5 + $0x38] sm:$0xff]  ;;  %v204_v15 = vld [vmem:[#allocation5 + $0x48] sm:$0xff]  ;;  %s885_s28 = scalar_lea.vmem %s1156_s4, 1024  ;;  %s961_s6 = smov [#allocation7]  }
  0x59   : > { %721 = vmatpush3.bf16.msra.mxu0 %v718_v3  ;;  %758 = vmatpush3.bf16.msra.mxu1 %v718_v3  ;;  %v730_v13 = vpack.c.bf16 %v202_v12, %v201_v11  ;;  %v203_v14 = vld [vmem:[#allocation5 + $0x40] sm:$0xff]  ;;  %v205_v17 = vld [vmem:[#allocation5 + $0x50] sm:$0xff]  ;;  %v206_v18 = vld [vmem:[#allocation5 + $0x58] sm:$0xff]  ;;  %p886_p4 = scmp.ne.s32.totalorder %s1156_s4, %s885_s28  ;;  %s889_s7 = sshll.u32 %s961_s6, 4  ;;  %s890_s7 = int_to_ptr.vmem [resolvable:$false] %s889_s7 }
  0x5a   : > { %723 = vmatprep.subr.bf16.mxu0 %v722_v5  ;;  %751 = vmatprep.subr.bf16.mxu1 %v722_v5  ;;  %v734_v16 = vpack.c.bf16 %v204_v15, %v203_v14  ;;  %v738_v19 = vpack.c.bf16 %v206_v18, %v205_v17  ;;  %v207_v20 = vld [vmem:[#allocation5 + $0x60] sm:$0xff]  ;;  %v208_v21 = vld [vmem:[#allocation5 + $0x68] sm:$0xff]  ;;  %v209_v23 = vld [vmem:[#allocation5 + $0x70] sm:$0xff]  ;;  %s891_s20 = scalar_lea.vmem %s890_s7, 2048  ;;  %p892_p10 = scmp.lt.s32.totalorder %s1156_s4, %s890_s7 }
  0x5b   : > { %694 = vmatprep.mubr.f32.mxu0 %v179_v9  ;;  %706 = vmatprep.mubr.f32.mxu1 %v187_v10  ;;  %v742_v22 = vpack.c.bf16 %v208_v21, %v207_v20  ;;  %v210_v24 = vld [vmem:[#allocation5 + $0x78] sm:$0xff]  ;;  %v180_v26 = vld [vmem:[%s1128_s3 + $0x8] sm:$0xff]  ;;  %v181_v28 = vld [vmem:[%s1128_s3 + $0x10] sm:$0xff]  ;;  %p887_p6 = pnand %p886_p4, %p1073_p12  ;;  %p893_p13 = scmp.lt.s32.totalorder %s891_s20, %s885_s28 }
  0x5c   : > { %v746_v25 = vpack.c.bf16 %v210_v24, %v209_v23  ;;  %v188_v27 = vld [vmem:[%s1128_s3 + $0x48] sm:$0xff]  ;;  %v189_v29 = vld [vmem:[%s1128_s3 + $0x50] sm:$0xff]  ;;  %v182_v30 = vld [vmem:[%s1128_s3 + $0x18] sm:$0xff] }
  0x5d   : > { %725 = vmatpush3.bf16.msra.mxu0 %v722_v5  ;;  %759 = vmatpush3.bf16.msra.mxu1 %v722_v5  ;;  %v190_v31 = vld [vmem:[%s1128_s3 + $0x58] sm:$0xff]  ;;  %v183_v32 = vld [vmem:[%s1128_s3 + $0x20] sm:$0xff]  ;;  %v184_v34 = vld [vmem:[%s1128_s3 + $0x28] sm:$0xff]  ;;  %p888_p8 = pneg %p887_p6  ;;  %p894_p3 = por %p893_p13, %p892_p10 }
  0x5e   : > { %727 = vmatprep.subr.bf16.mxu0 %v726_v8  ;;  %752 = vmatprep.subr.bf16.mxu1 %v726_v8  ;;  %v191_v33 = vld [vmem:[%s1128_s3 + $0x60] sm:$0xff]  ;;  %v192_v35 = vld [vmem:[%s1128_s3 + $0x68] sm:$0xff]  ;;  %v185_v36 = vld [vmem:[%s1128_s3 + $0x30] sm:$0xff] }
  0x5f   : > { %v193_v37 = vld [vmem:[%s1128_s3 + $0x70] sm:$0xff]  ;;  %v186_v38 = vld [vmem:[%s1128_s3 + $0x38] sm:$0xff]  ;;  %p895_p7 = pnand %p894_p3, %p888_p8 }
  0x60   : > { %v194_v39 = vld [vmem:[%s1128_s3 + $0x78] sm:$0xff] }
  0x61   : > { %729 = vmatpush3.bf16.msra.mxu0 %v726_v8  ;;  %760 = vmatpush3.bf16.msra.mxu1 %v726_v8 }
  0x62   : > { %731 = vmatprep.subr.bf16.mxu0 %v730_v13  ;;  %753 = vmatprep.subr.bf16.mxu1 %v730_v13 }
  0x65   : > { %733 = vmatpush3.bf16.msra.mxu0 %v730_v13  ;;  %761 = vmatpush3.bf16.msra.mxu1 %v730_v13 }
  0x66   : > { %735 = vmatprep.subr.bf16.mxu0 %v734_v16  ;;  %754 = vmatprep.subr.bf16.mxu1 %v734_v16 }
  0x69   : > { %737 = vmatpush3.bf16.msra.mxu0 %v734_v16  ;;  %762 = vmatpush3.bf16.msra.mxu1 %v734_v16 }
  0x6a   : > { %739 = vmatprep.subr.bf16.mxu0 %v738_v19  ;;  %755 = vmatprep.subr.bf16.mxu1 %v738_v19 }
  0x6d   : > { %741 = vmatpush3.bf16.msra.mxu0 %v738_v19  ;;  %763 = vmatpush3.bf16.msra.mxu1 %v738_v19 }
  0x6e   : > { %743 = vmatprep.subr.bf16.mxu0 %v742_v22  ;;  %756 = vmatprep.subr.bf16.mxu1 %v742_v22 }
  0x71   : > { %745 = vmatpush3.bf16.msra.mxu0 %v742_v22  ;;  %764 = vmatpush3.bf16.msra.mxu1 %v742_v22 }
  0x72   : > { %747 = vmatprep.subr.bf16.mxu0 %v746_v25  ;;  %757 = vmatprep.subr.bf16.mxu1 %v746_v25 }
  0x75   : > { %749 = vmatpush3.bf16.msra.mxu0 %v746_v25  ;;  %765 = vmatpush3.bf16.msra.mxu1 %v746_v25 }
  0x78   : > { %695 = vmatmul.mubr.f32.vlgmr.msra.gmra.mrb[0].mxu0 %v180_v26  ;;  %707 = vmatmul.mubr.f32.vlgmr.msra.gmra.mrb[0].mxu1 %v188_v27 }
  0x79   : > { %697 = vmatprep.mubr.f32.mxu0 %v181_v28  ;;  %709 = vmatprep.mubr.f32.mxu1 %v189_v29 }
  0x7c   : > { %698 = vmatmul.mubr.f32.gmra.mrb[2].mxu0 %v182_v30  ;;  %710 = vmatmul.mubr.f32.gmra.mrb[2].mxu1 %v190_v31 }
  0x7d   : > { %700 = vmatprep.mubr.f32.mxu0 %v183_v32  ;;  %712 = vmatprep.mubr.f32.mxu1 %v191_v33 }
  0x80   : > { %701 = vmatmul.mubr.f32.gmra.mrb[4].mxu0 %v184_v34  ;;  %713 = vmatmul.mubr.f32.gmra.mrb[4].mxu1 %v192_v35 }
  0x81   : > { %703 = vmatprep.mubr.f32.mxu0 %v185_v36  ;;  %715 = vmatprep.mubr.f32.mxu1 %v193_v37 }
  0x84   : > { %704 = vmatmul.mubr.f32.gmra.mrb[6].mxu0 %v186_v38  ;;  %716 = vmatmul.mubr.f32.gmra.mrb[6].mxu1 %v194_v39 }
 0x14b   : > { %v696_v40 = vpop.f32.mrb[0].mxu0  ;;  %v708_v41 = vpop.f32.mrb[0].mxu1 }
 0x14c   : > { %v277_v42 = vpop.f32.mrb[1].mxu0  ;;  %v317_v43 = vpop.f32.mrb[1].mxu1 }
 0x14d   : > { %v586_v44 = vpack.c.bf16 %v696_v40, %v277_v42  ;;  %v606_v45 = vpack.c.bf16 %v708_v41, %v317_v43 }
 0x14f   : > { %587 = vst [vmem:[%s176_s17] sm:$0xff] %v586_v44   ;;  %626 = vst [vmem:[%s176_s17 + $0x20] sm:$0xff] %v606_v45   ;;  %v699_v46 = vpop.f32.mrb[2].mxu0  ;;  %v711_v47 = vpop.f32.mrb[2].mxu1 }
 0x150   : > { %v287_v48 = vpop.f32.mrb[3].mxu0  ;;  %v327_v49 = vpop.f32.mrb[3].mxu1 }
 0x151   : > { %v591_v50 = vpack.c.bf16 %v699_v46, %v287_v48  ;;  %v611_v51 = vpack.c.bf16 %v711_v47, %v327_v49 }
 0x153   : > { %623 = vst [vmem:[%s176_s17 + $0x8] sm:$0xff] %v591_v50   ;;  %627 = vst [vmem:[%s176_s17 + $0x28] sm:$0xff] %v611_v51   ;;  %v702_v52 = vpop.f32.mrb[4].mxu0  ;;  %v714_v53 = vpop.f32.mrb[4].mxu1 }
 0x154   : > { %v297_v54 = vpop.f32.mrb[5].mxu0  ;;  %v337_v55 = vpop.f32.mrb[5].mxu1 }
 0x155   : > { %v596_v56 = vpack.c.bf16 %v702_v52, %v297_v54  ;;  %v616_v57 = vpack.c.bf16 %v714_v53, %v337_v55 }
 0x157   : > { %624 = vst [vmem:[%s176_s17 + $0x10] sm:$0xff] %v596_v56   ;;  %628 = vst [vmem:[%s176_s17 + $0x30] sm:$0xff] %v616_v57   ;;  %v705_v58 = vpop.f32.mrb[6].mxu0  ;;  %v717_v59 = vpop.f32.mrb[6].mxu1 }
 0x158   : > { %v307_v60 = vpop.f32.mrb[7].mxu0  ;;  %v347_v61 = vpop.f32.mrb[7].mxu1 }
 0x159   : > { %v601_v62 = vpack.c.bf16 %v705_v58, %v307_v60  ;;  %v621_v63 = vpack.c.bf16 %v717_v59, %v347_v61 }
 0x15b   : > { %625 = vst [vmem:[%s176_s17 + $0x18] sm:$0xff] %v601_v62   ;;  %629 = vst [vmem:[%s176_s17 + $0x38] sm:$0xff] %v621_v63  }
 0x15c   : > { %898 = shalt.err (!%p895_p7)
}
 0x15d   : > { %s899_s18 = scalar_lea.hbm %s1161_s23, 1024  ;;  %s903_s26 = scalar_lea.hbm %s1207_s2, 2048 }
 0x15e   : > { %p900_p9 = scmp.ne.s32.totalorder %s1161_s23, %s899_s18  ;;  %p904_p5 = scmp.lt.u32.totalorder %s1161_s23, %s1207_s2 }
 0x15f   : > { %p905_p11 = scmp.lt.u32.totalorder %s903_s26, %s899_s18  ;;  %p907_p4 = scmp.lt.u32.totalorder %s899_s18, %s1161_s23 }
 0x160   : > { %p901_p1 = pnand %p900_p9, %p1073_p12 }
 0x161   : > { %p906_p2 = por %p905_p11, %p904_p5 }
 0x162   : > { %p902_p0 = pneg %p901_p1 }
 0x163   : > { %p908_p6 = por %p907_p4, %p906_p2 }
 0x165   : > { %p909_p8 = pnand %p908_p6, %p902_p0 }
 0x167   : > { %912 = shalt.err (!%p909_p8)
}
 0x168   : > { %s962_s3 = smov 64   ;;  %s963_s15 = smov 4  }
 0x169   : > { %772 = dma.vmem_to_hbm [thread:$0]  (%p1073_p12), %s1156_s4, 1024, %s1161_s23, %s437_s13, %s962_s3, %s962_s3, %s963_s15  }
 0x16a PF: > { %s465_s17 = sand.u32 1, %s943_s9   ;;  %p1222_p10 = scmp.ne.s32.totalorder %s1212_s16, 0 }
 0x16b   : > { %p1223_p13 = scmp.ge.s32.totalorder %s955_s12, 2  ;;  %s466_s5 = scalar_lea.sflag [#allocation4], %s465_s17 }
 0x16d   : > { %p783_p3 = pnand %p1223_p13, %p1222_p10 }
 0x16f   : > { %938 = dma.done.wait (!%p783_p3), %s466_s5, 1024  }
 0x170   : > { %940 = vsyncadd (!%p783_p3), %s466_s5, 4294966272  ;;  %p16_p7 = scmp.ge.s32.totalorder %s1035_s21, 4   ;;  %s1224_s9 = smov %s947_s10 }
 0x171   : > { %s1225_s10 = smov %s951_s11  ;;  %s1226_s11 = smov %s1069_s8 }
 0x172   : > { %s1227_s12 = smov %s1035_s21  ;;  %18 = sbr.rel (!%p16_p7) target bundleno = 6 (0x6), region = 77 }
 0x179   :  { %471 = vsyncpa [#allocation3], 1 }
 0x17a   :  { %473 = vsyncpa [#allocation3 + $0x1], 1 }
 0x17b   :  { %474 = vsyncpa [#allocation6], 1 }
 0x17c   :  { %475 = vsyncpa [#allocation4], 1 }
 0x17d   :  { %477 = vsyncpa [#allocation4 + $0x1], 1 }

</bundles_post_ra>
